<compile_context>
chip_gen: v7x
topology: tpu7x:2x2x1
jax: 0.10.0
libtpu: 0.0.40
codegen_flags: <defaults>
</compile_context>

<pallas_src>
import functools

import jax
import jax.numpy as jnp
from jax.experimental import pallas as pl
from jax.experimental.pallas import tpu as pltpu


# ----------------------------- config / helpers -----------------------------

MATMUL_DTYPE = jnp.bfloat16      # MXU operand dtype (accumulation stays f32)

_PPAR = pltpu.CompilerParams(dimension_semantics=("parallel",))
_PARB = pltpu.CompilerParams(dimension_semantics=("arbitrary",))


def _pick_tile(m):
    # Largest row tile (<=512) dividing m: mem-bound tiled kernels reach ~85% of HBM
    # roofline at 512-row tiles vs ~63% at 256 (irrelevant at the tiny demo sizes).
    for t in (512, 256, 128, 64, 32, 16, 8):
        if m % t == 0:
            return t
    return m


def _erf_approx(x):
    # TODO(synk): exact-erf GELU uses Abramowitz-Stegun 7.1.26 (|abs err| < 1.5e-7)
    # instead of lax.erf to guarantee Mosaic lowering; matches nn.GELU() to f32 noise.
    a1, a2, a3, a4, a5 = 0.254829592, -0.284496736, 1.421413741, -1.453152027, 1.061405429
    p = 0.3275911
    ax = jnp.abs(x)
    t = 1.0 / (1.0 + p * ax)
    poly = ((((a5 * t + a4) * t + a3) * t + a2) * t + a1) * t
    y = 1.0 - poly * jnp.exp(-ax * ax)
    return jnp.where(x >= 0, y, -y)


def _gelu_exact(x):
    return 0.5 * x * (1.0 + _erf_approx(x * 0.7071067811865475))


# ----------------------------- fused linear kernel -----------------------------
# One kernel covers: [optional LayerNorm prologue] -> x @ W + b -> [optional GELU]
# -> [optional residual add].  bf16 MXU operands, f32 accumulation / epilogue.

def _make_linear_kernel(has_ln, act, has_res, eps=1e-6):
    def kernel(*refs):
        if has_ln:
            x_ref, g_ref, bl_ref, w_ref, b_ref = refs[:5]
            rest = refs[5:]
        else:
            x_ref, w_ref, b_ref = refs[:3]
            rest = refs[3:]
        res_ref = rest[0] if has_res else None
        o_ref = rest[-1]

        x = x_ref[...].astype(jnp.float32)
        if has_ln:
            mu = jnp.mean(x, axis=-1, keepdims=True)
            var = jnp.mean((x - mu) ** 2, axis=-1, keepdims=True)
            x = (x - mu) * jax.lax.rsqrt(var + eps)
            x = x * g_ref[...] + bl_ref[...]
        y = jnp.dot(x.astype(MATMUL_DTYPE), w_ref[...],
                    preferred_element_type=jnp.float32) + b_ref[...]
        if act == "gelu":
            y = _gelu_exact(y)
        if has_res:
            y = y + res_ref[...].astype(jnp.float32)
        o_ref[...] = y
    return kernel


def linear_fused(x, w, b, *, ln=None, act=None, residual=None):
    """y = [LN(x)] @ w + b [+ GELU] [+ residual].  w stored [in, out] (torch Linear^T)."""
    m, kdim = x.shape
    k2, n = w.shape
    assert kdim == k2
    tm = _pick_tile(m)

    inputs = [x]
    in_specs = [pl.BlockSpec((tm, kdim), lambda i: (i, 0))]
    if ln is not None:
        g, bb = ln
        inputs += [g.reshape(1, kdim), bb.reshape(1, kdim)]
        in_specs += [pl.BlockSpec((1, kdim), lambda i: (0, 0)),
                     pl.BlockSpec((1, kdim), lambda i: (0, 0))]
    inputs += [w.astype(MATMUL_DTYPE), b.reshape(1, n)]
    in_specs += [pl.BlockSpec((kdim, n), lambda i: (0, 0)),
                 pl.BlockSpec((1, n), lambda i: (0, 0))]
    if residual is not None:
        inputs.append(residual)
        in_specs.append(pl.BlockSpec((tm, n), lambda i: (i, 0)))

    return pl.pallas_call(
        _make_linear_kernel(ln is not None, act, residual is not None),
        out_shape=jax.ShapeDtypeStruct((m, n), jnp.float32),
        grid=(m // tm,),
        in_specs=in_specs,
        out_specs=pl.BlockSpec((tm, n), lambda i: (i, 0)),
        compiler_params=_PPAR,
    )(*inputs)


# ----------------------------- factorized attention -----------------------------
# Lane-dense layout: q/k/v/conv_v are [N, C] (C on the lane axis).  The per-head
# k_softmax^T v is obtained by a single full-C matmul masked with a block-diagonal
# head mask, keeping the MXU lane-dense and the output store unmasked.

def _factor_att_kernel(q_ref, k_ref, v_ref, cv_ref, mask_ref, o_ref, *, scale):
    q = q_ref[0].astype(jnp.float32)        # [N, C]
    k = k_ref[0].astype(jnp.float32)
    v = v_ref[0]
    cv = cv_ref[0].astype(jnp.float32)

    # softmax over tokens (axis 0) per channel  == k.softmax(dim=2) per (head, ch)
    mx = jnp.max(k, axis=0, keepdims=True)
    e = jnp.exp(k - mx)
    ks = e / jnp.sum(e, axis=0, keepdims=True)

    # full-C (k_softmax)^T @ v : [C, C], then block-diagonal head mask -> per-head k^T v
    ktv = jax.lax.dot_general(ks.astype(MATMUL_DTYPE), v.astype(MATMUL_DTYPE),
                              (((0,), (0,)), ((), ())),
                              preferred_element_type=jnp.float32)
    ktv = ktv * mask_ref[...]

    # q @ (k_softmax^T v) : [N, C]
    fa = jnp.dot(q.astype(MATMUL_DTYPE), ktv.astype(MATMUL_DTYPE),
                 preferred_element_type=jnp.float32)

    o_ref[0] = scale * fa + q * cv          # + crpe (q * conv(v)), lane-dense store


def factor_attention(q, k, v, conv_v, scale, num_heads):
    b, n, c = q.shape
    ch = c // num_heads
    hid = jnp.arange(c) // ch
    head_mask = (hid[:, None] == hid[None, :]).astype(jnp.float32)   # [C, C] block-diagonal
    return pl.pallas_call(
        functools.partial(_factor_att_kernel, scale=scale),
        out_shape=jax.ShapeDtypeStruct((b, n, c), jnp.float32),
        grid=(b,),
        in_specs=[pl.BlockSpec((1, n, c), lambda i: (i, 0, 0))] * 4
                 + [pl.BlockSpec((c, c), lambda i: (0, 0))],
        out_specs=pl.BlockSpec((1, n, c), lambda i: (i, 0, 0)),
        compiler_params=_PPAR,
    )(q, k, v, conv_v, head_mask)


# ----------------------------- depthwise conv -----------------------------

def _dwconv_kernel(x_ref, w_ref, b_ref, o_ref, *, k, h, w):
    # TODO(synk): the dx (sublane-axis) shifts could use pltpu.roll on the XLU instead of
    # shifted slices to avoid relayout copies; kept as slices for guaranteed lowering.
    x = x_ref[0].astype(jnp.float32)         # [H+k-1, W+k-1, C] (padded)
    wt = w_ref[...].astype(jnp.float32)      # [k*k, C]
    c = x.shape[-1]
    acc = jnp.zeros((h, w, c), jnp.float32)
    for dy in range(k):
        row = x[dy:dy + h]                   # leading-axis slice (cheap)
        for dx in range(k):
            acc = acc + row[:, dx:dx + w, :] * wt[dy * k + dx][None, None, :]
    o_ref[0] = acc + b_ref[...][None]


def depthwise_conv2d(x_nhwc, weight, bias, k):
    """Depthwise KxK conv, stride 1, 'same' padding. weight: [k,k,C], bias: [C]."""
    b, h, w, c = x_nhwc.shape
    p = k // 2
    xp = jnp.pad(x_nhwc, ((0, 0), (p, p), (p, p), (0, 0)))
    hp, wp = h + 2 * p, w + 2 * p
    return pl.pallas_call(
        functools.partial(_dwconv_kernel, k=k, h=h, w=w),
        out_shape=jax.ShapeDtypeStruct((b, h, w, c), jnp.float32),
        grid=(b,),
        in_specs=[
            pl.BlockSpec((1, hp, wp, c), lambda i: (i, 0, 0, 0)),
            pl.BlockSpec((k * k, c), lambda i: (0, 0)),
            pl.BlockSpec((1, c), lambda i: (0, 0)),
        ],
        out_specs=pl.BlockSpec((1, h, w, c), lambda i: (i, 0, 0, 0)),
        compiler_params=_PPAR,
    )(xp, weight.reshape(k * k, c), bias.reshape(1, c))


# ----------------------------- ECA -----------------------------

def _eca_kernel(x_ref, m_ref, o_ref):
    x = x_ref[0].astype(jnp.float32)                        # [H, W, C]
    y = jnp.mean(x, axis=(0, 1), keepdims=True)             # global avg pool -> [1, 1, C]
    # TODO(synk): the 3-tap channel conv could be two lane rolls + FMA instead of a band
    # matmul; the [C,C] band is tiny and the MXU call is free under the mem-bound gating.
    z = jnp.dot(y[0], m_ref[...], preferred_element_type=jnp.float32)
    s = jax.nn.sigmoid(z)                                   # [1, C]
    o_ref[0] = x * s[None]


def eca(x_nhwc, conv_w):
    """Efficient channel attention; conv_w holds the 3 taps of torch Conv1d(1,1,3,bias=False)."""
    b, h, w, c = x_nhwc.shape
    idx = jnp.arange(c)
    diff = idx[None, :] - idx[:, None]        # [j, out_c] -> out_c - j
    band = (jnp.where(diff == 1, conv_w[0], 0.0)
            + jnp.where(diff == 0, conv_w[1], 0.0)
            + jnp.where(diff == -1, conv_w[2], 0.0)).astype(jnp.float32)
    return pl.pallas_call(
        _eca_kernel,
        out_shape=jax.ShapeDtypeStruct((b, h, w, c), jnp.float32),
        grid=(b,),
        in_specs=[
            pl.BlockSpec((1, h, w, c), lambda i: (i, 0, 0, 0)),
            pl.BlockSpec((c, c), lambda i: (0, 0)),
        ],
        out_specs=pl.BlockSpec((1, h, w, c), lambda i: (i, 0, 0, 0)),
        compiler_params=_PPAR,
    )(x_nhwc, band)


# ----------------------------- aggregate conv + BN + Hardswish -----------------------------

def _agg_stats_kernel(x_ref, w_ref, y_ref, sum_ref, sq_ref):
    # BN batch statistics accumulate in resident (constant-index) output blocks.
    @pl.when(pl.program_id(0) == 0)
    def _():
        sum_ref[...] = jnp.zeros_like(sum_ref)
        sq_ref[...] = jnp.zeros_like(sq_ref)
    y = jnp.dot(x_ref[...].astype(MATMUL_DTYPE), w_ref[...],
                preferred_element_type=jnp.float32)
    y_ref[...] = y
    sum_ref[...] += jnp.sum(y, axis=0, keepdims=True)
    sq_ref[...] += jnp.sum(y * y, axis=0, keepdims=True)


def _scale_shift_hswish_kernel(x_ref, s_ref, t_ref, o_ref):
    y = x_ref[...] * s_ref[...] + t_ref[...]
    o_ref[...] = y * jnp.clip(y + 3.0, 0.0, 6.0) * (1.0 / 6.0)     # Hardswish


def aggregate_bn_hswish(x, w, gamma, beta, eps=1e-5):
    """1x1 conv (bias=False) -> BatchNorm2d (training-mode batch stats, fresh module) -> Hardswish."""
    m, kdim = x.shape
    n = w.shape[1]
    tm = _pick_tile(m)
    y, s, sq = pl.pallas_call(
        _agg_stats_kernel,
        out_shape=(jax.ShapeDtypeStruct((m, n), jnp.float32),
                   jax.ShapeDtypeStruct((1, n), jnp.float32),
                   jax.ShapeDtypeStruct((1, n), jnp.float32)),
        grid=(m // tm,),
        in_specs=[pl.BlockSpec((tm, kdim), lambda i: (i, 0)),
                  pl.BlockSpec((kdim, n), lambda i: (0, 0))],
        out_specs=(pl.BlockSpec((tm, n), lambda i: (i, 0)),
                   pl.BlockSpec((1, n), lambda i: (0, 0)),
                   pl.BlockSpec((1, n), lambda i: (0, 0))),
        compiler_params=_PARB,       # stats accumulate across the row axis
    )(x, w.astype(MATMUL_DTYPE))

    mean = s[0] / m
    var = jnp.maximum(sq[0] / m - mean * mean, 0.0)     # biased batch variance
    scale = gamma * jax.lax.rsqrt(var + eps)
    shift = beta - mean * scale

    return pl.pallas_call(
        _scale_shift_hswish_kernel,
        out_shape=jax.ShapeDtypeStruct((m, n), jnp.float32),
        grid=(m // tm,),
        in_specs=[pl.BlockSpec((tm, n), lambda i: (i, 0)),
                  pl.BlockSpec((1, n), lambda i: (0, 0)),
                  pl.BlockSpec((1, n), lambda i: (0, 0))],
        out_specs=pl.BlockSpec((tm, n), lambda i: (i, 0)),
        compiler_params=_PPAR,
    )(y, scale.reshape(1, n), shift.reshape(1, n))


# ----------------------------- model (glue + params) -----------------------------

CRPE_WINDOW = {3: 2, 5: 3, 7: 3}      # MHCAEncoder default crpe_window


def init_mhca_encoder_params(key, dim, num_heads, mlp_ratio):
    ch = dim // num_heads
    hidden = dim * mlp_ratio
    keys = jax.random.split(key, 16)
    p = {}
    p["cpe_w"] = 0.1 * jax.random.normal(keys[0], (3, 3, dim), jnp.float32)
    p["cpe_b"] = 0.01 * jax.random.normal(keys[1], (dim,), jnp.float32)
    p["crpe"] = []
    kk = 2
    for win, heads in CRPE_WINDOW.items():
        cs = heads * ch
        w = 0.1 * jax.random.normal(keys[kk], (win, win, cs), jnp.float32)
        b = 0.01 * jax.random.normal(keys[kk + 1], (cs,), jnp.float32)
        p["crpe"].append((win, cs, w, b))
        kk += 2
    p["ln1_g"] = jnp.ones((dim,), jnp.float32)
    p["ln1_b"] = jnp.zeros((dim,), jnp.float32)
    p["ln2_g"] = jnp.ones((dim,), jnp.float32)
    p["ln2_b"] = jnp.zeros((dim,), jnp.float32)
    p["qkv_w"] = 0.05 * jax.random.normal(keys[8], (dim, 3 * dim), jnp.float32)
    p["qkv_b"] = 0.01 * jax.random.normal(keys[9], (3 * dim,), jnp.float32)
    p["proj_w"] = 0.05 * jax.random.normal(keys[10], (dim, dim), jnp.float32)
    p["proj_b"] = 0.01 * jax.random.normal(keys[11], (dim,), jnp.float32)
    p["fc1_w"] = 0.05 * jax.random.normal(keys[12], (dim, hidden), jnp.float32)
    p["fc1_b"] = 0.01 * jax.random.normal(keys[13], (hidden,), jnp.float32)
    p["fc2_w"] = 0.05 * jax.random.normal(keys[14], (hidden, dim), jnp.float32)
    p["fc2_b"] = 0.01 * jax.random.normal(keys[15], (dim,), jnp.float32)
    return p


def init_mhca_stage_params(key, embed_dim, out_embed_dim, num_heads, mlp_ratio, num_path):
    keys = jax.random.split(key, num_path + 2)
    encs = [init_mhca_encoder_params(keys[i], embed_dim, num_heads, mlp_ratio)
            for i in range(num_path)]
    eca_w = 0.3 * jax.random.normal(keys[num_path], (3,), jnp.float32)
    agg_in = embed_dim * (num_path + 1)
    agg_w = 0.05 * jax.random.normal(keys[num_path + 1], (agg_in, out_embed_dim), jnp.float32)
    return {
        "num_heads": num_heads,
        "encoders": encs,
        "eca_w": eca_w,
        "agg_w": agg_w,                                # 1x1 conv, bias=False
        "agg_bn_g": jnp.ones((out_embed_dim,), jnp.float32),
        "agg_bn_b": jnp.zeros((out_embed_dim,), jnp.float32),
    }


def mhca_encoder_forward(x_tokens, h, w, p, num_heads):
    """MHCAEncoder: ConvPosEnc -> LN+FactorAtt+ConvRelPosEnc (+res) -> LN+MLP (+res). NHWC out."""
    b, n, c = x_tokens.shape
    ch = c // num_heads
    scale = ch ** (-0.5)

    # ConvPosEnc: depthwise 3x3 + residual, fused by adding 1.0 to the center tap.
    feat = x_tokens.reshape(b, h, w, c)
    cpe_w = p["cpe_w"].at[1, 1, :].add(1.0)
    x_flat = depthwise_conv2d(feat, cpe_w, p["cpe_b"], 3).reshape(b * n, c)

    # norm1 fused into qkv projection; qkv channels are [3, head, ch] head-major,
    # so q/k/v are already in the lane-dense [B, N, C] layout the attention kernel wants.
    qkv = linear_fused(x_flat, p["qkv_w"], p["qkv_b"],
                       ln=(p["ln1_g"], p["ln1_b"])).reshape(b, n, 3 * c)
    q = qkv[..., :c]
    k = qkv[..., c:2 * c]
    v = qkv[..., 2 * c:]

    # ConvRelPosEnc: depthwise convs (k=3/5/7) on v; head-major channel order matches
    # torch's rearrange('B h (H W) Ch -> B (h Ch) H W') with zero transposes needed.
    v_img = v.reshape(b, h, w, c)
    parts, off = [], 0
    for (win, cs, cw, cb) in p["crpe"]:
        parts.append(depthwise_conv2d(v_img[..., off:off + cs], cw, cb, win))
        off += cs
    conv_v = jnp.concatenate(parts, axis=-1).reshape(b, n, c)

    att = factor_attention(q, k, v, conv_v, scale, num_heads)     # [B, N, C] lane-dense

    # proj with fused residual add (x = x + proj(att))
    x_flat = linear_fused(att.reshape(b * n, c), p["proj_w"], p["proj_b"], residual=x_flat)

    # norm2 fused into fc1 (+ exact GELU); fc2 with fused residual
    h1 = linear_fused(x_flat, p["fc1_w"], p["fc1_b"],
                      ln=(p["ln2_g"], p["ln2_b"]), act="gelu")
    x_flat = linear_fused(h1, p["fc2_w"], p["fc2_b"], residual=x_flat)

    return x_flat.reshape(b, h, w, c)                             # NHWC image


def mhca_stage_forward(inputs_nchw, params):
    """MHCA_stage.forward. inputs: list of NCHW tensors; returns NCHW."""
    num_heads = params["num_heads"]
    inputs = [jnp.transpose(t, (0, 2, 3, 1)) for t in inputs_nchw]   # -> NHWC

    att_outputs = [eca(inputs[0], params["eca_w"])]
    for x_nhwc, enc_p in zip(inputs, params["encoders"]):
        b, h, w, c = x_nhwc.shape
        tokens = x_nhwc.reshape(b, h * w, c)
        att_outputs.append(mhca_encoder_forward(tokens, h, w, enc_p, num_heads))

    out = jnp.concatenate(att_outputs, axis=-1)        # channel concat (== torch.cat dim=1)
    b, h, w, cin = out.shape
    cout = params["agg_w"].shape[1]
    y = aggregate_bn_hswish(out.reshape(b * h * w, cin), params["agg_w"],
                            params["agg_bn_g"], params["agg_bn_b"])
    y = y.reshape(b, h, w, cout)
    return jnp.transpose(y, (0, 3, 1, 2))              # back to NCHW


# ----------------------------- demo -----------------------------

if __name__ == "__main__":
    key = jax.random.PRNGKey(0)
    B, C, H, W = 2, 64, 8, 8          # embed_dim=64 (8 heads -> head_dim=8)
    OUT_C = 128
    NUM_HEADS = 8
    MLP_RATIO = 3
    NUM_PATH = 2

    k_in, k_par = jax.random.split(key)
    in_keys = jax.random.split(k_in, NUM_PATH)
    inputs = [jax.random.normal(in_keys[i], (B, C, H, W), jnp.float32)
              for i in range(NUM_PATH)]

    params = init_mhca_stage_params(k_par, C, OUT_C, NUM_HEADS, MLP_RATIO, NUM_PATH)

    out = mhca_stage_forward(inputs, params)
    out = jax.block_until_ready(out)
    assert out.shape == (B, OUT_C, H, W), out.shape
    assert bool(jnp.all(jnp.isfinite(out)))
    print("KERNEL_OK")
</pallas_src>

<mosaic_0001>
module attributes {stable_mosaic.version = 11 : i64} {
  func.func @_eca_kernel(%arg0: i32, %arg1: memref<1x8x8x64xf32, #tpu.memory_space<vmem>>, %arg2: memref<64x64xf32, #tpu.memory_space<vmem>>, %arg3: memref<1x8x8x64xf32, #tpu.memory_space<vmem>>) attributes {dimension_semantics = [#tpu.dimension_semantics<parallel>], iteration_bounds = array<i64: 2>, scalar_prefetch = 0 : i64, scratch_operands = 0 : i64, tpu.core_type = #tpu.core_type<tc>, window_params = [{transform_indices = @transform_0, window_bounds = array<i64: 1, 8, 8, 64>}, {pipeline_mode = #tpu.pipeline_mode<synchronous>, transform_indices = @transform_1, window_bounds = array<i64: 64, 64>}, {transform_indices = @transform_2, window_bounds = array<i64: 1, 8, 8, 64>}]} {
    %c0 = arith.constant 0 : index
    %c0_0 = arith.constant 0 : index
    %c0_1 = arith.constant 0 : index
    %c0_2 = arith.constant 0 : index
    %0 = vector.load %arg1[%c0, %c0_0, %c0_1, %c0_2] : memref<1x8x8x64xf32, #tpu.memory_space<vmem>>, vector<1x8x8x64xf32>
    %1 = vector.shape_cast %0 : vector<1x8x8x64xf32> to vector<8x8x64xf32>
    %cst = arith.constant dense<0.000000e+00> : vector<64xf32>
    %2 = vector.multi_reduction <add>, %1, %cst [0, 1] : vector<8x8x64xf32> to vector<64xf32>
    %3 = vector.shape_cast %2 : vector<64xf32> to vector<1x1x64xf32>
    %cst_3 = arith.constant 6.400000e+01 : f32
    %4 = vector.broadcast %cst_3 : f32 to vector<1x1x64xf32>
    %5 = arith.divf %3, %4 : vector<1x1x64xf32>
    %6 = vector.shape_cast %5 : vector<1x1x64xf32> to vector<1x64xf32>
    %c0_4 = arith.constant 0 : index
    %c0_5 = arith.constant 0 : index
    %7 = vector.load %arg2[%c0_4, %c0_5] : memref<64x64xf32, #tpu.memory_space<vmem>>, vector<64x64xf32>
    %cst_6 = arith.constant dense<0.000000e+00> : vector<1x64xf32>
    %8 = tpu.matmul %6, %7, %cst_6 {dimension_numbers = #tpu.dot_dimension_numbers<[1], [0], [0], [1], [0, 0, 1, 1], [], []>} : vector<1x64xf32>, vector<64x64xf32>, vector<1x64xf32> -> vector<1x64xf32>
    %9 = arith.negf %8 : vector<1x64xf32>
    %10 = math.exp %9 : vector<1x64xf32>
    %cst_7 = arith.constant 1.000000e+00 : f32
    %11 = vector.broadcast %cst_7 : f32 to vector<1x64xf32>
    %12 = arith.addf %11, %10 : vector<1x64xf32>
    %13 = arith.divf %11, %12 : vector<1x64xf32>
    %14 = vector.shape_cast %13 : vector<1x64xf32> to vector<1x1x64xf32>
    %15 = vector.broadcast %14 : vector<1x1x64xf32> to vector<8x8x64xf32>
    %16 = arith.mulf %1, %15 : vector<8x8x64xf32>
    %c0_8 = arith.constant 0 : index
    %c0_9 = arith.constant 0 : index
    %c0_10 = arith.constant 0 : index
    %c0_11 = arith.constant 0 : index
    %17 = vector.load %arg3[%c0_8, %c0_9, %c0_10, %c0_11] : memref<1x8x8x64xf32, #tpu.memory_space<vmem>>, vector<1x8x8x64xf32>
    %18 = vector.shape_cast %17 : vector<1x8x8x64xf32> to vector<8x8x64xf32>
    %19 = vector.shape_cast %16 : vector<8x8x64xf32> to vector<1x8x8x64xf32>
    tpu.vector_store %arg3[%c0_8, %c0_9, %c0_10, %c0_11], %19 {strides = array<i32>} : memref<1x8x8x64xf32, #tpu.memory_space<vmem>>, vector<1x8x8x64xf32>,
    return
  }
  func.func @transform_0(%arg0: i32) -> (i32, i32, i32, i32) {
    %c0_i32 = arith.constant 0 : i32
    %c0_i32_0 = arith.constant 0 : i32
    %c0_i32_1 = arith.constant 0 : i32
    %c0_i32_2 = arith.constant 0 : i32
    return %arg0, %c0_i32, %c0_i32_0, %c0_i32_1 : i32, i32, i32, i32
  }
  func.func @transform_1(%arg0: i32) -> (i32, i32) {
    %c0_i32 = arith.constant 0 : i32
    %c0_i32_0 = arith.constant 0 : i32
    %c0_i32_1 = arith.constant 0 : i32
    return %c0_i32, %c0_i32_0 : i32, i32
  }
  func.func @transform_2(%arg0: i32) -> (i32, i32, i32, i32) {
    %c0_i32 = arith.constant 0 : i32
    %c0_i32_0 = arith.constant 0 : i32
    %c0_i32_1 = arith.constant 0 : i32
    %c0_i32_2 = arith.constant 0 : i32
    return %arg0, %c0_i32, %c0_i32_0, %c0_i32_1 : i32, i32, i32, i32
  }
}

</mosaic_0001>

<bundles_post_ra>
// kernel: tpu_custom_call.1
= control target key start
LH: loop header
LB: loop body
LE: loop exit
PB: predicated region body
PF: predicated region fallthrough
CT: control target
= control target key end

     0   :  { %7 = vsyncpa [#allocation3], 0  ;;  %s934_s0 = inlined_call_operand.hbm [shape: f32[2,8,8,64], index: 0, kind: input, shape index: {}]   ;;  %s935_s1 = inlined_call_operand.hbm [shape: f32[64,64], index: 1, kind: input, shape index: {}]   ;;  %s936_s2 = inlined_call_operand.hbm [shape: f32[2,8,8,64], index: 2, kind: output, shape index: {}]  }
   0x1   :  { %9 = vsyncpa [#allocation3 + $0x1], 0 }
   0x2   :  { %10 = vsyncpa [#allocation6], 0 }
   0x3   :  { %11 = vsyncpa [#allocation4], 0 }
   0x4   :  { %13 = vsyncpa [#allocation4 + $0x1], 0  ;;  %s696_s9 = smov 0   ;;  %s698_s10 = smov 0  }
   0x5   :  { %s700_s11 = smov 0   ;;  %s702_s12 = smov 0  }
   0x6 LB: > { %s717_s13 = sadd.s32 4294967295, %s669_s12   ;;  %s413_s14 = sadd.s32 4294967294, %s669_s12   ;;  %s669_s12 = sphi %s702_s12, %s956_s12   ;;  %s665_s11 = sphi %s700_s11, %s955_s11   ;;  %s661_s10 = sphi %s698_s10, %s954_s10   ;;  %s657_s9 = sphi %s696_s9, %s953_s9  }
   0x7   : > { %p39_p0 = scmp.ne.s32.totalorder %s661_s10, %s657_s9  ;;  %p937_p1 = scmp.eq.s32.totalorder %s717_s13, 0 }
   0x8   : > { %p90_p3 = scmp.eq.s32.totalorder %s413_s14, 1  ;;  %p414_p5 = scmp.ge.s32.totalorder %s669_s12, 1 }
   0x9   : > { %p726_p4 = por %p937_p1, %p39_p0  ;;  %p97_p7 = scmp.lt.s32.totalorder %s669_s12, 3 }
   0xa   : > { %p731_p6 = por %p90_p3, %p39_p0  ;;  %s671_s18 = smov [#allocation5]  }
   0xb   : > { %s940_s15 = scalar_select %p726_p4, 1, 0 }
   0xc   : > { %s941_s16 = scalar_select %p731_p6, 1, 0 }
   0xd   : > { %p736_p8 = pnand %p414_p5, %p97_p7  ;;  %s109_s19 = sshll.u32 %s671_s18, 4  ;;  %s740_s19 = int_to_ptr.vmem [resolvable:$true] %s109_s19 }
   0xe   : > { %s752_s21 = sadd.s32 1, %s669_s12   ;;  %s26_s22 = sadd.s32 1, %s665_s11 }
   0xf   : > { %s942_s17 = scalar_select %p736_p8, 1, 0 }
  0x10   : > { %p481_p9 = pneg %p736_p8  ;;  %s23_s23 = ssub.s32 %s669_s12, %s752_s21 }
  0x11   : > { %s541_s26 = scalar_lea.hbm %s935_s1, 1024 }
  0x12   : > { %p747_p11 = pnand %p481_p9, %p937_p1  ;;  %p542_p12 = scmp.ne.s32.totalorder %s935_s1, %s541_s26 }
  0x13   : > { %p548_p5 = scmp.lt.u32.totalorder %s541_s26, %s935_s1 }
  0x14   : > { %p543_p13 = pneg %p747_p11 }
  0x16   : > { %p544_p0 = pnand %p543_p13, %p542_p12 }
  0x18   : > { %p545_p3 = pneg %p544_p0 }
  0x1a   : > { %p550_p7 = pnand %p548_p5, %p545_p3 }
  0x1c   : > { %553 = shalt.err (!%p550_p7)
}
  0x1d   : > { %s554_s3 = scalar_lea.vmem %s740_s19, 1024  ;;  %p562_p2 = scmp.lt.s32.totalorder %s740_s19, %s740_s19 }
  0x1e   : > { %p555_p9 = scmp.ne.s32.totalorder %s740_s19, %s554_s3  ;;  %p563_p6 = scmp.lt.s32.totalorder %s554_s3, %s554_s3 }
  0x20   : > { %p557_p10 = pnand %p555_p9, %p543_p13  ;;  %p564_p4 = por %p563_p6, %p562_p2 }
  0x22   : > { %p558_p1 = pneg %p557_p10 }
  0x24   : > { %p565_p8 = pnand %p564_p4, %p558_p1 }
  0x26   : > { %568 = shalt.err (!%p565_p8)
}
  0x27   : > { %s672_s4 = smov 128   ;;  %s673_s5 = smov 8  }
  0x28   : > { %484 = dma.hbm_to_vmem [thread:$0]  (!%p747_p11), %s935_s1, 1024, %s740_s19, [#allocation6], %s672_s4, %s672_s4, %s673_s5  }
  0x29   : > { %p24_p1 = scmp.eq.s32.totalorder %s23_s23, 0  ;;  %p33_p2 = scmp.ne.s32.totalorder %s665_s11, %s661_s10 }
  0x2a   : > { %p34_p4 = scmp.eq.s32.totalorder %s669_s12, 0  ;;  %p494_p6 = scmp.lt.s32.totalorder %s669_s12, 2 }
  0x2b   : > { %s786_s8 = scalar_select %p24_p1, %s665_s11, %s26_s22  }
  0x2c   : > { %p35_p8 = por %p34_p4, %p33_p2  ;;  %p944_p10 = scmp.eq.s32.totalorder %s717_s13, 1 }
  0x2d   : > { %s123_s18 = sand.u32 1, %s665_s11   ;;  %s431_s20 = sshll.u32 %s669_s12, 10 }
  0x2e   : > { %p790_p12 = por %p944_p10, %p33_p2  ;;  %s417_s24 = sshll.u32 %s123_s18, 6 }
  0x2f   : > { %s799_s27 = scalar_lea.hbm %s934_s0, %s431_s20  ;;  %s127_s19 = scalar_lea.vmem [#allocation2], %s417_s24 }
  0x30   : > { %s134_s22 = sshll.u32 %s127_s19, 4  ;;  %p801_p11 = pnand %p494_p6, %p35_p8  ;;  %s805_s22 = int_to_ptr.vmem [resolvable:$true] %s134_s22 }
  0x31   : > { %s807_s28 = scalar_lea.sflag [#allocation3], %s123_s18  ;;  %s569_s29 = scalar_lea.hbm %s799_s27, 1024 }
  0x32   : > { %p570_p13 = scmp.ne.s32.totalorder %s799_s27, %s569_s29  ;;  %p571_p0 = pneg %p801_p11 }
  0x33   : > { %s574_s6 = scalar_lea.hbm %s934_s0, 2048  ;;  %p575_p7 = scmp.lt.u32.totalorder %s799_s27, %s934_s0 }
  0x34   : > { %p572_p3 = pnand %p571_p0, %p570_p13  ;;  %p576_p9 = scmp.lt.u32.totalorder %s574_s6, %s569_s29 }
  0x35   : > { %p578_p2 = scmp.lt.u32.totalorder %s569_s29, %s799_s27 }
  0x36   : > { %p573_p5 = pneg %p572_p3  ;;  %p577_p1 = por %p576_p9, %p575_p7 }
  0x38   : > { %p579_p4 = por %p578_p2, %p577_p1 }
  0x3a   : > { %p580_p6 = pnand %p579_p4, %p573_p5 }
  0x3c   : > { %583 = shalt.err (!%p580_p6)
}
  0x3d   : > { %s584_s18 = scalar_lea.vmem %s805_s22, 1024  ;;  %s674_s24 = smov [#allocation2]  }
  0x3e   : > { %p585_p8 = scmp.ne.s32.totalorder %s805_s22, %s584_s18  ;;  %s589_s25 = sshll.u32 %s674_s24, 4  ;;  %s590_s25 = int_to_ptr.vmem [resolvable:$false] %s589_s25 }
  0x3f   : > { %s591_s26 = scalar_lea.vmem %s590_s25, 2048  ;;  %p592_p3 = scmp.lt.s32.totalorder %s805_s22, %s590_s25 }
  0x40   : > { %p587_p10 = pnand %p585_p8, %p571_p0  ;;  %p593_p7 = scmp.lt.s32.totalorder %s591_s26, %s584_s18 }
  0x42   : > { %p588_p13 = pneg %p587_p10  ;;  %p594_p9 = por %p593_p7, %p592_p3 }
  0x44   : > { %p595_p1 = pnand %p594_p9, %p588_p13 }
  0x46   : > { %598 = shalt.err (!%p595_p1)
}
  0x47   : > { %488 = dma.hbm_to_vmem [thread:$0]  (!%p801_p11), %s799_s27, 1024, %s805_s22, %s807_s28, %s672_s4, %s672_s4, %s673_s5  }
  0x48   : > { %p947_p0 = scmp.ne.s32.totalorder %s942_s17, 0 }
  0x49   : > { %s841_s19 = sand.u32 (!%p947_p0), 1, %s661_s10   ;;  %p948_p5 = scmp.ne.s32.totalorder (!%p947_p0), %s940_s15, 0 }
  0x4a   : > { %146 = sbr.rel (%p947_p0) target bundleno = 377 (0x179), region = 28  ;;  %s421_s29 = sshll.u32 (!%p947_p0), %s841_s19, 6 }
  0x4b   : > { %s149_s30 = scalar_lea.sflag (!%p947_p0), [#allocation3], %s841_s19  ;;  %s847_s23 = scalar_lea.vmem (!%p947_p0), [#allocation2], %s421_s29 }
  0x51   : > { %644 = dma.done.wait (%p948_p5), %s149_s30, 1024  }
  0x52   : > { %646 = vsyncadd (%p948_p5), %s149_s30, 4294966272  ;;  %p949_p11 = scmp.eq.s32.totalorder %s717_s13, 0 }
  0x54   : > { %648 = dma.done.wait (%p949_p11), [#allocation6], 1024   ;;  %p950_p2 = pmov %p949_p11 }
  0x55   : > { %v675_v0 = vmov 0.0|0.0   ;;  %vm676_vm0 = vmmov 0   ;;  %v677_v1 = vmov 0.0   ;;  %v209_v2 = vld [vmem:[#allocation5] sm:$0xff]  ;;  %v210_v3 = vld [vmem:[#allocation5 + $0x8] sm:$0xff]  ;;  %v211_v4 = vld [vmem:[#allocation5 + $0x10] sm:$0xff]  ;;  %v296_v49 = vlaneseq }
  0x56   : > { %650 = vsyncadd (%p950_p2), [#allocation6], 4294966272  ;;  %461 = vmatprep.subr.bf16.mxu0 %v675_v0  ;;  %458 = vmatprep.mubr.msk.f32.mxu0 %vm676_vm0, %v677_v1  ;;  %vm185_vm1 = vcmask 523264   ;;  %v462_v5 = vpack.c.bf16 %v210_v3, %v209_v2  ;;  %v212_v6 = vld [vmem:[#allocation5 + $0x18] sm:$0xff]  ;;  %v177_v7 = vld [vmem:[%s847_s23] sm:$0xff]  ;;  %s432_s15 = sshll.u32 %s717_s13, 10 }
  0x57   : > { %v465_v8 = vpack.c.bf16 %v212_v6, %v211_v4  ;;  %v178_v9 = vld [vmem:[%s847_s23 + $0x8] sm:$0xff]  ;;  %v179_v10 = vld [vmem:[%s847_s23 + $0x10] sm:$0xff]  ;;  %v180_v11 = vld [vmem:[%s847_s23 + $0x18] sm:$0xff]  ;;  %v186_v12 = vsel %vm185_vm1, %v177_v7, 0.0  ;;  %v297_v50 = vshrl.u32 %v296_v49, 7  ;;  %s176_s17 = scalar_lea.vmem [#allocation7], %s421_s29  ;;  %s880_s22 = scalar_lea.hbm %s936_s2, %s432_s15 }
  0x58   : > { %463 = vmatpush3.bf16.msra.mxu0 %v462_v5  ;;  %v213_v13 = vld [vmem:[#allocation5 + $0x20] sm:$0xff]  ;;  %v214_v14 = vld [vmem:[#allocation5 + $0x28] sm:$0xff]  ;;  %v187_v15 = vsel %vm185_vm1, %v178_v9, 0.0  ;;  %v189_v16 = vsel %vm185_vm1, %v179_v10, 0.0  ;;  %v191_v19 = vsel %vm185_vm1, %v180_v11, 0.0  ;;  %v215_v23 = vld [vmem:[#allocation5 + $0x30] sm:$0xff] }
  0x59   : > { %464 = vmatprep.subr.bf16.mxu0 %v675_v0  ;;  %v181_v17 = vld [vmem:[%s847_s23 + $0x20] sm:$0xff]  ;;  %v188_v18 = vadd.f32 %v187_v15, %v186_v12  ;;  %v468_v20 = vpack.c.bf16 %v214_v14, %v213_v13  ;;  %v182_v21 = vld [vmem:[%s847_s23 + $0x28] sm:$0xff]  ;;  %v216_v24 = vld [vmem:[#allocation5 + $0x38] sm:$0xff]  ;;  %v298_v51 = vsub.s32 0, %v297_v50  ;;  %s330_s4 = sshll.u32 %s176_s17, 4  ;;  %s317_s13 = scalar_lea.sflag [#allocation4], %s841_s19  ;;  %s882_s4 = int_to_ptr.vmem [resolvable:$true] %s330_s4 }
  0x5a   : > { %v193_v25 = vsel %vm185_vm1, %v181_v17, 0.0  ;;  %v183_v26 = vld [vmem:[%s847_s23 + $0x30] sm:$0xff]  ;;  %v195_v28 = vsel %vm185_vm1, %v182_v21, 0.0  ;;  %v471_v29 = vpack.c.bf16 %v216_v24, %v215_v23  ;;  %v184_v30 = vld [vmem:[%s847_s23 + $0x38] sm:$0xff]  ;;  %s599_s28 = scalar_lea.vmem %s882_s4, 1024  ;;  %s678_s3 = smov [#allocation7]  }
  0x5b   : > { %v190_v22 = vadd.f32 %v189_v16, %v188_v18  ;;  %v197_v32 = vsel %vm185_vm1, %v183_v26, 0.0  ;;  %v199_v34 = vsel %vm185_vm1, %v184_v30, 0.0  ;;  %p600_p4 = scmp.ne.s32.totalorder %s882_s4, %s599_s28  ;;  %s603_s6 = sshll.u32 %s678_s3, 4  ;;  %s604_s6 = int_to_ptr.vmem [resolvable:$false] %s603_s6 }
  0x5c   : > { %466 = vmatpush3.bf16.msra.mxu0 %v465_v8  ;;  %s605_s7 = scalar_lea.vmem %s604_s6, 2048  ;;  %p606_p10 = scmp.lt.s32.totalorder %s882_s4, %s604_s6 }
  0x5d   : > { %467 = vmatprep.subr.bf16.mxu0 %v675_v0  ;;  %v192_v27 = vadd.f32 %v191_v19, %v190_v22  ;;  %p601_p6 = pnand %p600_p4, %p790_p12  ;;  %p607_p13 = scmp.lt.s32.totalorder %s605_s7, %s599_s28 }
  0x5f   : > { %v194_v31 = vadd.f32 %v193_v25, %v192_v27  ;;  %p602_p8 = pneg %p601_p6  ;;  %p608_p3 = por %p607_p13, %p606_p10 }
  0x60   : > { %469 = vmatpush3.bf16.msra.mxu0 %v468_v20 }
  0x61   : > { %470 = vmatprep.subr.bf16.mxu0 %v675_v0  ;;  %v196_v33 = vadd.f32 %v195_v28, %v194_v31  ;;  %p609_p7 = pnand %p608_p3, %p602_p8 }
  0x63   : > { %v198_v35 = vadd.f32 %v197_v32, %v196_v33 }
  0x64   : > { %472 = vmatpush3.bf16.msra.mxu0 %v471_v29 }
  0x65   : > { %v200_v36 = vadd.f32 %v199_v34, %v198_v35 }
  0x67   : > { %v201_v37 = vrot.slane %v200_v36, 4 }
  0x69   : > { %v202_v38 = vadd.f32 %v201_v37, %v200_v36 }
  0x6b   : > { %v203_v39 = vrot.slane %v202_v38, 2 }
  0x6d   : > { %v204_v40 = vadd.f32 %v203_v39, %v202_v38 }
  0x6f   : > { %v205_v41 = vrot.slane %v204_v40, 1 }
  0x71   : > { %v206_v42 = vadd.f32 %v205_v41, %v204_v40 }
  0x73   : > { %v208_v43 = vmul.f32 0.015625, %v206_v42 }
  0x75   : > { %459 = vmatmul.mubr.msk.f32.vlgmr.msra.gmra.mrb[0].mxu0 %vm185_vm1, %v208_v43 }
 0x148   : > { %v286_v44 = vpop.f32.mrb[0].mxu0 }
 0x149   : > { %v425_v45 = vmul.f32 -1.442695, %v286_v44  ;;  %v460_v46 = vpop.f32.mrb[1].mxu0 }
 0x14b   : > { %537 = vpow2.f32 %v425_v45 }
 0x155   : > { %v538_v47 = vpop.eup %537 }
 0x156   : > { %v293_v48 = vadd.f32 1.0, %v538_v47 }
 0x158   : > { %539 = vrcp.f32 %v293_v48 }
 0x162   : > { %v540_v52 = vpop.eup %539 }
 0x163   : > { %v299_v53 = vrot.slane %v540_v52, %v298_v51 }
 0x165   : > { %v300_v54 = vmul.f32 %v299_v53, %v177_v7  ;;  %v301_v55 = vmul.f32 %v299_v53, %v178_v9  ;;  %v302_v56 = vmul.f32 %v299_v53, %v179_v10  ;;  %v303_v57 = vmul.f32 %v299_v53, %v180_v11 }
 0x166   : > { %v304_v58 = vmul.f32 %v299_v53, %v181_v17  ;;  %v305_v59 = vmul.f32 %v299_v53, %v182_v21  ;;  %v306_v60 = vmul.f32 %v299_v53, %v183_v26  ;;  %v307_v61 = vmul.f32 %v299_v53, %v184_v30 }
 0x167   : > { %308 = vst.msk [vmem:[%s176_s17] sm:$0xff] %vm185_vm1, %v300_v54  ;;  %309 = vst.msk [vmem:[%s176_s17 + $0x8] sm:$0xff] %vm185_vm1, %v301_v55 }
 0x168   : > { %310 = vst.msk [vmem:[%s176_s17 + $0x10] sm:$0xff] %vm185_vm1, %v302_v56  ;;  %311 = vst.msk [vmem:[%s176_s17 + $0x18] sm:$0xff] %vm185_vm1, %v303_v57 }
 0x169   : > { %312 = vst.msk [vmem:[%s176_s17 + $0x20] sm:$0xff] %vm185_vm1, %v304_v58  ;;  %313 = vst.msk [vmem:[%s176_s17 + $0x28] sm:$0xff] %vm185_vm1, %v305_v59 }
 0x16a   : > { %314 = vst.msk [vmem:[%s176_s17 + $0x30] sm:$0xff] %vm185_vm1, %v306_v60  ;;  %315 = vst.msk [vmem:[%s176_s17 + $0x38] sm:$0xff] %vm185_vm1, %v307_v61 }
 0x16b   : > { %612 = shalt.err (!%p609_p7)
}
 0x16c   : > { %s613_s20 = scalar_lea.hbm %s880_s22, 1024  ;;  %s617_s25 = scalar_lea.hbm %s936_s2, 2048 }
 0x16d   : > { %p614_p9 = scmp.ne.s32.totalorder %s880_s22, %s613_s20  ;;  %p618_p5 = scmp.lt.u32.totalorder %s880_s22, %s936_s2 }
 0x16e   : > { %p619_p11 = scmp.lt.u32.totalorder %s617_s25, %s613_s20  ;;  %p621_p4 = scmp.lt.u32.totalorder %s613_s20, %s880_s22 }
 0x16f   : > { %p615_p1 = pnand %p614_p9, %p790_p12 }
 0x170   : > { %p620_p2 = por %p619_p11, %p618_p5 }
 0x171   : > { %p616_p0 = pneg %p615_p1 }
 0x172   : > { %p622_p6 = por %p621_p4, %p620_p2 }
 0x174   : > { %p623_p8 = pnand %p622_p6, %p616_p0 }
 0x176   : > { %626 = shalt.err (!%p623_p8)
}
 0x177   : > { %s679_s30 = smov 128   ;;  %s680_s23 = smov 8  }
 0x178   : > { %479 = dma.vmem_to_hbm [thread:$0]  (%p790_p12), %s882_s4, 1024, %s880_s22, %s317_s13, %s679_s30, %s679_s30, %s680_s23  }
 0x179 PF: > { %s345_s15 = sand.u32 1, %s657_s9   ;;  %p951_p10 = scmp.ne.s32.totalorder %s941_s16, 0 }
 0x17a   : > { %p952_p13 = scmp.ge.s32.totalorder %s669_s12, 2  ;;  %s346_s17 = scalar_lea.sflag [#allocation4], %s345_s15 }
 0x17c   : > { %p490_p3 = pnand %p952_p13, %p951_p10 }
 0x17e   : > { %652 = dma.done.wait (!%p490_p3), %s346_s17, 1024  }
 0x17f   : > { %654 = vsyncadd (!%p490_p3), %s346_s17, 4294966272  ;;  %p16_p7 = scmp.ge.s32.totalorder %s752_s21, 4   ;;  %s953_s9 = smov %s661_s10 }
 0x180   : > { %s954_s10 = smov %s665_s11  ;;  %s955_s11 = smov %s786_s8 }
 0x181   : > { %s956_s12 = smov %s752_s21  ;;  %18 = sbr.rel (!%p16_p7) target bundleno = 6 (0x6), region = 77 }
 0x188   :  { %351 = vsyncpa [#allocation3], 1 }
 0x189   :  { %353 = vsyncpa [#allocation3 + $0x1], 1 }
 0x18a   :  { %354 = vsyncpa [#allocation6], 1 }
 0x18b   :  { %355 = vsyncpa [#allocation4], 1 }
 0x18c   :  { %357 = vsyncpa [#allocation4 + $0x1], 1 }

</bundles_post_ra>
